<compile_context>
chip_gen: v6e
topology: v6e:2x2x1
jax: 0.10.0
libtpu: 0.0.40
codegen_flags: <defaults>
</compile_context>

<pallas_src>
import functools
import math

import jax
import jax.numpy as jnp
import numpy as np
from jax.experimental import pallas as pl
from jax.experimental.pallas import tpu as pltpu

_QAM_NORM = 1.0 / math.sqrt(42.0)        # 64-QAM unit-average-power scaling
_QAM_OFFSET = -7.0 * _QAM_NORM           # constant part of (2*idx - 7) * norm


def _round_up(n, m):
    return ((n + m - 1) // m) * m


@functools.lru_cache(maxsize=None)
def _selection_matrix(n_symbols):
    """(6S, 2S) f32 matrix mapping bits -> [I | Q] PAM levels, affine pre-folded.

    level = (2*idx - 7)*norm, idx = 4*b0 + 2*b1 + b2 (MSB first)
          = sum_k bit_k * ([8,4,2]*norm)  +  (-7*norm)
    The -7*norm constant is added in the kernel after the matmul.
    """
    w_i = np.array([8.0, 4.0, 2.0, 0.0, 0.0, 0.0]) * _QAM_NORM
    w_q = np.array([0.0, 0.0, 0.0, 8.0, 4.0, 2.0]) * _QAM_NORM
    eye = np.eye(n_symbols)
    mi = np.kron(eye, w_i.reshape(6, 1))             # (6S, S)
    mq = np.kron(eye, w_q.reshape(6, 1))             # (6S, S)
    return jnp.asarray(np.concatenate([mi, mq], axis=1), dtype=jnp.float32)


def qam64_encoder_kernel(x_ref, w1_ref, b1_ref, w2_ref, b2_ref, m_ref, out_ref):
    # fc1 -> ReLU : bf16 MXU inputs, f32 accumulation, f32 elementwise.
    h = jnp.dot(x_ref[...], w1_ref[...], preferred_element_type=jnp.float32)
    h = jnp.maximum(h + b1_ref[...], 0.0)

    # fc2 pre-activation; sigmoid(z) > 0.5  <=>  z > 0  (no transcendental).
    z = jnp.dot(h.astype(w2_ref.dtype), w2_ref[...],
                preferred_element_type=jnp.float32) + b2_ref[...]
    bits = (z > 0.0).astype(jnp.float32)             # (TB, 6S) in {0, 1}

    # Fused bit-selection matmul: (TB, 6S) @ (6S, 2S) -> [I | Q] levels.
    iq = jnp.dot(bits, m_ref[...], preferred_element_type=jnp.float32)
    out_ref[...] = iq + _QAM_OFFSET                  # single lane-dense store


def qam64_encoder(x, w1, b1, w2, b2, *, block_b=256):
    """x: (B, n_feature).  w1: (F, H) = fc1.weight.T, b1: (H,),
    w2: (H, 6*n_output) = fc2.weight.T, b2: (6*n_output,).
    Returns (B, n_output, 2) f32 with (I, Q) on the last axis."""
    B, F = x.shape
    H = w1.shape[1]
    O6 = w2.shape[1]
    assert O6 % 6 == 0
    S = O6 // 6
    m_iq = _selection_matrix(S)                      # (6S, 2S), built once

    # Batch tile: at least 8 sublanes; pad B up to a whole number of tiles.
    tb = min(block_b, _round_up(B, 8))
    b_pad = _round_up(B, tb)
    x_p = x.astype(jnp.bfloat16)                     # bf16 MXU input
    if b_pad != B:
        x_p = jnp.pad(x_p, ((0, b_pad - B), (0, 0)))

    w1_b = w1.astype(jnp.bfloat16)
    w2_b = w2.astype(jnp.bfloat16)
    b1_2d = b1.reshape(1, H).astype(jnp.float32)
    b2_2d = b2.reshape(1, O6).astype(jnp.float32)

    def resident(shape):                             # constant index_map -> stays in VMEM
        return pl.BlockSpec(shape, lambda i: (0,) * len(shape))

    iq = pl.pallas_call(
        qam64_encoder_kernel,
        grid=(b_pad // tb,),
        in_specs=[
            pl.BlockSpec((tb, F), lambda i: (i, 0)),   # x: tiled over batch
            resident((F, H)),                          # fc1 weight
            resident((1, H)),                          # fc1 bias
            resident((H, O6)),                         # fc2 weight
            resident((1, O6)),                         # fc2 bias
            resident((O6, 2 * S)),                     # fused selection matrix
        ],
        out_specs=pl.BlockSpec((tb, 2 * S), lambda i: (i, 0)),
        out_shape=jax.ShapeDtypeStruct((b_pad, 2 * S), jnp.float32),
        compiler_params=pltpu.CompilerParams(
            dimension_semantics=("parallel",)),        # megacore-shardable batch
    )(x_p, w1_b, b1_2d, w2_b, b2_2d, m_iq)

    iq = iq[:B]
    # Layout plumbing outside the kernel: (B, 2S) -> (B, S, 2) = (I, Q).
    return jnp.stack([iq[:, :S], iq[:, S:]], axis=-1)


def qam64_encoder_ref(x, w1, b1, w2, b2):
    """Pure-JAX reference mirroring the kernel's bf16 MXU inputs / f32 accum,
    but keeping the original sigmoid + threshold + (2*idx-7)*norm formulation."""
    h = jnp.dot(x.astype(jnp.bfloat16), w1.astype(jnp.bfloat16),
                preferred_element_type=jnp.float32) + b1
    h = jnp.maximum(h, 0.0)
    z = jnp.dot(h.astype(jnp.bfloat16), w2.astype(jnp.bfloat16),
                preferred_element_type=jnp.float32) + b2
    bits = (jax.nn.sigmoid(z) > 0.5).astype(jnp.float32)
    groups = bits.reshape(x.shape[0], -1, 6)
    idx_i = groups[..., 0] * 4 + groups[..., 1] * 2 + groups[..., 2]
    idx_q = groups[..., 3] * 4 + groups[..., 4] * 2 + groups[..., 5]
    i_sym = (2.0 * idx_i - 7.0) * _QAM_NORM
    q_sym = (2.0 * idx_q - 7.0) * _QAM_NORM
    return jnp.stack([i_sym, q_sym], axis=-1)


if __name__ == "__main__":
    # Module defaults: n_feature=192, h_dim=96, n_output=10 (fc2 -> 60 bits -> 10 symbols)
    B, F, H, N_OUT = 8, 192, 96, 10
    O6 = N_OUT * 6

    key = jax.random.PRNGKey(0)
    kx, kw1, kb1, kw2, kb2 = jax.random.split(key, 5)

    # Deterministic PyTorch-style Linear init: U(-1/sqrt(fan_in), 1/sqrt(fan_in))
    lim1 = 1.0 / math.sqrt(F)
    lim2 = 1.0 / math.sqrt(H)
    w1 = jax.random.uniform(kw1, (F, H), jnp.float32, -lim1, lim1)   # fc1.weight.T
    b1 = jax.random.uniform(kb1, (H,), jnp.float32, -lim1, lim1)
    w2 = jax.random.uniform(kw2, (H, O6), jnp.float32, -lim2, lim2)  # fc2.weight.T
    b2 = jax.random.uniform(kb2, (O6,), jnp.float32, -lim2, lim2)

    x = jax.random.normal(kx, (B, F), jnp.float32)

    out = qam64_encoder(x, w1, b1, w2, b2)
    jax.block_until_ready(out)
    assert out.shape == (B, N_OUT, 2) and out.dtype == jnp.float32

    ref = qam64_encoder_ref(x, w1, b1, w2, b2)
    np.testing.assert_allclose(np.asarray(out), np.asarray(ref), atol=1e-5, rtol=0)

    print("KERNEL_OK")
</pallas_src>

<mosaic_0001>
module attributes {stable_mosaic.version = 11 : i64} {
  func.func @qam64_encoder_kernel(%arg0: i32, %arg1: memref<8x192xbf16, #tpu.memory_space<vmem>>, %arg2: memref<192x96xbf16, #tpu.memory_space<vmem>>, %arg3: memref<1x96xf32, #tpu.memory_space<vmem>>, %arg4: memref<96x60xbf16, #tpu.memory_space<vmem>>, %arg5: memref<1x60xf32, #tpu.memory_space<vmem>>, %arg6: memref<60x20xf32, #tpu.memory_space<vmem>>, %arg7: memref<8x20xf32, #tpu.memory_space<vmem>>) attributes {dimension_semantics = [#tpu.dimension_semantics<parallel>], iteration_bounds = array<i64: 1>, scalar_prefetch = 0 : i64, scratch_operands = 0 : i64, tpu.core_type = #tpu.core_type<tc>, window_params = [{transform_indices = @transform_0, window_bounds = array<i64: 8, 192>}, {pipeline_mode = #tpu.pipeline_mode<synchronous>, transform_indices = @transform_1, window_bounds = array<i64: 192, 96>}, {pipeline_mode = #tpu.pipeline_mode<synchronous>, transform_indices = @transform_2, window_bounds = array<i64: 1, 96>}, {pipeline_mode = #tpu.pipeline_mode<synchronous>, transform_indices = @transform_3, window_bounds = array<i64: 96, 60>}, {pipeline_mode = #tpu.pipeline_mode<synchronous>, transform_indices = @transform_4, window_bounds = array<i64: 1, 60>}, {pipeline_mode = #tpu.pipeline_mode<synchronous>, transform_indices = @transform_5, window_bounds = array<i64: 60, 20>}, {transform_indices = @transform_6, window_bounds = array<i64: 8, 20>}]} {
    %c0 = arith.constant 0 : index
    %c0_0 = arith.constant 0 : index
    %0 = vector.load %arg1[%c0, %c0_0] : memref<8x192xbf16, #tpu.memory_space<vmem>>, vector<8x192xbf16>
    %c0_1 = arith.constant 0 : index
    %c0_2 = arith.constant 0 : index
    %1 = vector.load %arg2[%c0_1, %c0_2] : memref<192x96xbf16, #tpu.memory_space<vmem>>, vector<192x96xbf16>
    %cst = arith.constant dense<0.000000e+00> : vector<8x96xf32>
    %2 = tpu.matmul %0, %1, %cst {dimension_numbers = #tpu.dot_dimension_numbers<[1], [0], [0], [1], [0, 0, 1, 1], [], []>} : vector<8x192xbf16>, vector<192x96xbf16>, vector<8x96xf32> -> vector<8x96xf32>
    %c0_3 = arith.constant 0 : index
    %c0_4 = arith.constant 0 : index
    %3 = vector.load %arg3[%c0_3, %c0_4] : memref<1x96xf32, #tpu.memory_space<vmem>>, vector<1x96xf32>
    %4 = vector.broadcast %3 : vector<1x96xf32> to vector<8x96xf32>
    %5 = arith.addf %2, %4 : vector<8x96xf32>
    %cst_5 = arith.constant 0.000000e+00 : f32
    %6 = vector.broadcast %cst_5 : f32 to vector<8x96xf32>
    %7 = arith.maximumf %5, %6 : vector<8x96xf32>
    %8 = arith.truncf %7 : vector<8x96xf32> to vector<8x96xbf16>
    %c0_6 = arith.constant 0 : index
    %c0_7 = arith.constant 0 : index
    %9 = vector.load %arg4[%c0_6, %c0_7] : memref<96x60xbf16, #tpu.memory_space<vmem>>, vector<96x60xbf16>
    %cst_8 = arith.constant dense<0.000000e+00> : vector<8x60xf32>
    %10 = tpu.matmul %8, %9, %cst_8 {dimension_numbers = #tpu.dot_dimension_numbers<[1], [0], [0], [1], [0, 0, 1, 1], [], []>} : vector<8x96xbf16>, vector<96x60xbf16>, vector<8x60xf32> -> vector<8x60xf32>
    %c0_9 = arith.constant 0 : index
    %c0_10 = arith.constant 0 : index
    %11 = vector.load %arg5[%c0_9, %c0_10] : memref<1x60xf32, #tpu.memory_space<vmem>>, vector<1x60xf32>
    %12 = vector.broadcast %11 : vector<1x60xf32> to vector<8x60xf32>
    %13 = arith.addf %10, %12 : vector<8x60xf32>
    %cst_11 = arith.constant 0.000000e+00 : f32
    %14 = vector.broadcast %cst_11 : f32 to vector<8x60xf32>
    %15 = arith.cmpf ogt, %13, %14 : vector<8x60xf32>
    %16 = arith.extui %15 : vector<8x60xi1> to vector<8x60xi32>
    %17 = arith.sitofp %16 : vector<8x60xi32> to vector<8x60xf32>
    %c0_12 = arith.constant 0 : index
    %c0_13 = arith.constant 0 : index
    %18 = vector.load %arg6[%c0_12, %c0_13] : memref<60x20xf32, #tpu.memory_space<vmem>>, vector<60x20xf32>
    %cst_14 = arith.constant dense<0.000000e+00> : vector<8x20xf32>
    %19 = tpu.matmul %17, %18, %cst_14 {dimension_numbers = #tpu.dot_dimension_numbers<[1], [0], [0], [1], [0, 0, 1, 1], [], []>} : vector<8x60xf32>, vector<60x20xf32>, vector<8x20xf32> -> vector<8x20xf32>
    %cst_15 = arith.constant -1.08012342 : f32
    %20 = vector.broadcast %cst_15 : f32 to vector<8x20xf32>
    %21 = arith.addf %19, %20 : vector<8x20xf32>
    %c0_16 = arith.constant 0 : index
    %c0_17 = arith.constant 0 : index
    %22 = vector.load %arg7[%c0_16, %c0_17] : memref<8x20xf32, #tpu.memory_space<vmem>>, vector<8x20xf32>
    tpu.vector_store %arg7[%c0_16, %c0_17], %21 {strides = array<i32>} : memref<8x20xf32, #tpu.memory_space<vmem>>, vector<8x20xf32>,
    return
  }
  func.func @transform_0(%arg0: i32) -> (i32, i32) {
    %c0_i32 = arith.constant 0 : i32
    %c0_i32_0 = arith.constant 0 : i32
    return %arg0, %c0_i32 : i32, i32
  }
  func.func @transform_1(%arg0: i32) -> (i32, i32) {
    %c0_i32 = arith.constant 0 : i32
    %c0_i32_0 = arith.constant 0 : i32
    %c0_i32_1 = arith.constant 0 : i32
    return %c0_i32, %c0_i32_0 : i32, i32
  }
  func.func @transform_2(%arg0: i32) -> (i32, i32) {
    %c0_i32 = arith.constant 0 : i32
    %c0_i32_0 = arith.constant 0 : i32
    %c0_i32_1 = arith.constant 0 : i32
    return %c0_i32, %c0_i32_0 : i32, i32
  }
  func.func @transform_3(%arg0: i32) -> (i32, i32) {
    %c0_i32 = arith.constant 0 : i32
    %c0_i32_0 = arith.constant 0 : i32
    %c0_i32_1 = arith.constant 0 : i32
    return %c0_i32, %c0_i32_0 : i32, i32
  }
  func.func @transform_4(%arg0: i32) -> (i32, i32) {
    %c0_i32 = arith.constant 0 : i32
    %c0_i32_0 = arith.constant 0 : i32
    %c0_i32_1 = arith.constant 0 : i32
    return %c0_i32, %c0_i32_0 : i32, i32
  }
  func.func @transform_5(%arg0: i32) -> (i32, i32) {
    %c0_i32 = arith.constant 0 : i32
    %c0_i32_0 = arith.constant 0 : i32
    %c0_i32_1 = arith.constant 0 : i32
    return %c0_i32, %c0_i32_0 : i32, i32
  }
  func.func @transform_6(%arg0: i32) -> (i32, i32) {
    %c0_i32 = arith.constant 0 : i32
    %c0_i32_0 = arith.constant 0 : i32
    return %arg0, %c0_i32 : i32, i32
  }
}

</mosaic_0001>

<bundles_post_ra>
// kernel: tpu_custom_call.1
= control target key start
LH: loop header
LB: loop body
LE: loop exit
PB: predicated region body
PF: predicated region fallthrough
CT: control target
= control target key end

     0   :  { %v509_v1 = vmov 0   ;;  %v510_v3 = vmov 0.0   ;;  %vm135_vm0 = vcmask 523264   ;;  %s657_s0 = inlined_call_operand.vmem [shape: bf16[8,192], index: 0, kind: input, shape index: {}]   ;;  %s658_s1 = inlined_call_operand.vmem [shape: bf16[192,96], index: 1, kind: input, shape index: {}]   ;;  %s659_s2 = inlined_call_operand.vmem [shape: f32[1,96], index: 2, kind: input, shape index: {}]   ;;  %s660_s3 = inlined_call_operand.vmem [shape: bf16[96,60], index: 3, kind: input, shape index: {}]   ;;  %s661_s4 = inlined_call_operand.vmem [shape: f32[1,60], index: 4, kind: input, shape index: {}]   ;;  %s662_s5 = inlined_call_operand.vmem [shape: f32[60,20], index: 5, kind: input, shape index: {}]   ;;  %s663_s6 = inlined_call_operand.hbm [shape: f32[8,20], index: 6, kind: output, shape index: {}]  }
   0x1   :  { %v467_v0 = vld [vmem:[%s658_s1 + $0x38] sm:$0xff]   ;;  %139 = vmatprep.subr.bf16.mxu0 %v509_v1  ;;  %v468_v2 = vld [vmem:[%s658_s1 + $0x30] sm:$0xff]   ;;  %428 = vmatprep.subr.bf16.mxu1 %v510_v3  ;;  %v469_v4 = vld [vmem:[%s658_s1 + $0x28] sm:$0xff]  }
   0x2   :  { %140 = vmatpush1.bf16.msra.mxu0 %v467_v0  ;;  %v470_v5 = vld [vmem:[%s658_s1 + $0x20] sm:$0xff]   ;;  %v481_v8 = vld [vmem:[%s660_s3 + $0x28] sm:$0xff]   ;;  %v471_v9 = vld [vmem:[%s658_s1 + $0x18] sm:$0xff]  }
   0x3   :  { %141 = vmatprep.subr.bf16.mxu0 %v509_v1  ;;  %v25_v6 = vld [vmem:[%s657_s0] sm:$0xff]  ;;  %429 = vmatpush3.bf16.msra.mxu1 %v481_v8  ;;  %v472_v11 = vld [vmem:[%s658_s1 + $0x10] sm:$0xff]  }
   0x4   :  { %v387_v7 = vcombine.high %v25_v6, %v25_v6  ;;  %v482_v10 = vld [vmem:[%s660_s3 + $0x20] sm:$0xff]   ;;  %430 = vmatprep.subr.bf16.mxu1 %v510_v3 }
   0x6   :  { %142 = vmatpush1.bf16.msra.mxu0 %v468_v2  ;;  %400 = vmatprep.mubr.msk.bf16.mxu0 %vm135_vm0, %v387_v7 }
   0x7   :  { %143 = vmatprep.subr.bf16.mxu0 %v509_v1 }
   0xa   :  { %144 = vmatpush1.bf16.msra.mxu0 %v469_v4 }
   0xb   :  { %145 = vmatprep.subr.bf16.mxu0 %v509_v1 }
   0xe   :  { %146 = vmatpush1.bf16.msra.mxu0 %v470_v5 }
   0xf   :  { %147 = vmatprep.subr.bf16.mxu0 %v509_v1 }
  0x12   :  { %148 = vmatpush1.bf16.msra.mxu0 %v471_v9 }
  0x13   :  { %11 = vsyncpa [#allocation3], 0  ;;  %149 = vmatprep.subr.bf16.mxu0 %v509_v1  ;;  %431 = vmatpush3.bf16.msra.mxu1 %v482_v10  ;;  %v483_v12 = vld [vmem:[%s660_s3 + $0x18] sm:$0xff]   ;;  %v473_v13 = vld [vmem:[%s658_s1 + $0x8] sm:$0xff]   ;;  %v386_v20 = vcombine.low %v25_v6, %v25_v6  ;;  %vm511_vm1 = vmmov 0   ;;  %vm236_vm2 = vcmask 785408  }
  0x14   :  { %432 = vmatprep.subr.bf16.mxu1 %v510_v3  ;;  %v484_v14 = vld [vmem:[%s660_s3 + $0x10] sm:$0xff]   ;;  %v474_v15 = vld [vmem:[%s658_s1] sm:$0xff]   ;;  %v475_v16 = vld [vmem:[%s658_s1 + $0x58] sm:$0xff]   ;;  %440 = vmatprep.mubr.msk.bf16.mxu1 %vm511_vm1, %v510_v3  ;;  %vm295_vm3 = vcmask 1043456   ;;  %vm291_vm4 = vcmask 490496   ;;  %s512_s26 = smov [#allocation2]  }
  0x15   :  { %v476_v17 = vld [vmem:[%s658_s1 + $0x50] sm:$0xff]   ;;  %v477_v18 = vld [vmem:[%s658_s1 + $0x48] sm:$0xff]   ;;  %v478_v19 = vld [vmem:[%s658_s1 + $0x40] sm:$0xff]   ;;  %s377_s27 = sshll.u32 %s512_s26, 4  ;;  %vm369_vm6 = vcmask 162816   ;;  %s378_s27 = int_to_ptr.vmem [resolvable:$true] %s377_s27 }
  0x16   :  { %150 = vmatpush1.bf16.msra.mxu0 %v472_v11  ;;  %v485_v21 = vld [vmem:[%s660_s3 + $0x8] sm:$0xff]   ;;  %v486_v22 = vld [vmem:[%s660_s3] sm:$0xff]   ;;  %v290_v30 = vld [vmem:[%s662_s5 + $0x38] sm:$0xf]  ;;  %p492_p1 = scmp.lt.s32.totalorder %s378_s27, %s378_s27 }
  0x17   :  { %151 = vmatprep.subr.bf16.mxu0 %v509_v1  ;;  %433 = vmatpush3.bf16.msra.mxu1 %v483_v12  ;;  %v385_v23 = vld [vmem:[%s659_s2] ss:$0 sm:$0xff]  ;;  %v289_v32 = vld [vmem:[%s662_s5 + $0x30] sm:$0xff]  ;;  %v288_v33 = vld [vmem:[%s662_s5 + $0x28] sm:$0xff] }
  0x18   :  { %434 = vmatprep.subr.bf16.mxu1 %v510_v3  ;;  %v287_v34 = vld [vmem:[%s662_s5 + $0x20] sm:$0xff]  ;;  %v286_v35 = vld [vmem:[%s662_s5 + $0x18] sm:$0xff]  ;;  %v285_v36 = vld [vmem:[%s662_s5 + $0x10] sm:$0xff] }
  0x19   :  { %v284_v37 = vld [vmem:[%s662_s5 + $0x8] sm:$0xff]  ;;  %v283_v38 = vld [vmem:[%s662_s5] sm:$0xff]  ;;  %s487_s5 = scalar_lea.vmem %s378_s27, 128 }
  0x1a   :  { %152 = vmatpush1.bf16.msra.mxu0 %v473_v13  ;;  %v401_v39 = vld [vmem:[%s661_s4] ss:$0 sm:$0xff]  ;;  %p488_p0 = scmp.ne.s32.totalorder %s378_s27, %s487_s5  ;;  %p493_p2 = scmp.lt.s32.totalorder %s487_s5, %s487_s5 }
  0x1b   :  { %153 = vmatprep.subr.bf16.mxu0 %v509_v1  ;;  %435 = vmatpush3.bf16.msra.mxu1 %v484_v14 }
  0x1c   :  { %436 = vmatprep.subr.bf16.mxu1 %v510_v3  ;;  %p494_p3 = por %p493_p2, %p492_p1 }
  0x1e   :  { %154 = vmatpush1.bf16.msra.mxu0 %v474_v15  ;;  %p495_p4 = pnand %p494_p3, %p488_p0 }
  0x1f   :  { %163 = vmatprep.subr.bf16.mxu0 %v509_v1  ;;  %437 = vmatpush3.bf16.msra.mxu1 %v485_v21 }
  0x20   :  { %438 = vmatprep.subr.bf16.mxu1 %v510_v3 }
  0x22   :  { %164 = vmatpush2.bf16.msra.mxu0 %v475_v16 }
  0x23   :  { %165 = vmatprep.subr.bf16.mxu0 %v509_v1  ;;  %439 = vmatpush3.bf16.msra.mxu1 %v486_v22 }
  0x24   :  { %444 = vmatprep.subr.mxu1 %v510_v3 }
  0x26   :  { %166 = vmatpush2.bf16.msra.mxu0 %v476_v17 }
  0x27   :  { %167 = vmatprep.subr.bf16.mxu0 %v509_v1 }
  0x2a   :  { %168 = vmatpush2.bf16.msra.mxu0 %v477_v18 }
  0x2b   :  { %169 = vmatprep.subr.bf16.mxu0 %v509_v1 }
  0x2e   :  { %170 = vmatpush2.bf16.msra.mxu0 %v478_v19 }
  0x31   :  { %172 = vmatmul.mubr.bf16.vlgmr.msra.gmra.mxu0 %v386_v20 }
  0xf1   :  { %v173_v24 = vpop.f32.mrf.mxu0 }
  0xf2   :  { %v174_v25 = vadd.f32 %v385_v23, %v173_v24 }
  0xf3   :  { %v175_v26 = vpop.f32.mrf.mxu0 }
  0xf4   :  { %v179_v27 = vmax.f32 %v174_v25, 0.0 }
  0xf5   :  { %v176_v28 = vpop.f32.mrf.mxu0 }
  0xf6   :  { %v180_v29 = vpack.c.bf16 %v179_v27, %v179_v27 }
  0xf7   :  { %v177_v31 = vpop.f32.mrf.mxu0 }
  0xf8   :  { %441 = vmatmul.mubr.msk.bf16.vlgmr.msra.gmra.mxu1 %vm236_vm2, %v180_v29 }
  0xf9   :  { %445 = vmatpush3.msk.msra.mxu1 %vm295_vm3, %v290_v30  ;;  %460 = vmatprep.mubr.msk.f32.mxu1 %vm511_vm1, %v510_v3 }
  0xfa   :  { %446 = vmatprep.subr.mxu1 %v510_v3 }
  0xfb   :  { %447 = vmatpush3.msra.mxu1 %v289_v32 }
  0xfc   :  { %448 = vmatprep.subr.mxu1 %v510_v3 }
  0xfd   :  { %449 = vmatpush3.msra.mxu1 %v288_v33 }
  0xfe   :  { %450 = vmatprep.subr.mxu1 %v510_v3 }
  0xff   :  { %451 = vmatpush3.msra.mxu1 %v287_v34 }
 0x100   :  { %452 = vmatprep.subr.mxu1 %v510_v3 }
 0x101   :  { %453 = vmatpush3.msra.mxu1 %v286_v35 }
 0x102   :  { %454 = vmatprep.subr.mxu1 %v510_v3 }
 0x103   :  { %455 = vmatpush3.msra.mxu1 %v285_v36 }
 0x104   :  { %456 = vmatprep.subr.mxu1 %v510_v3 }
 0x105   :  { %457 = vmatpush3.msra.mxu1 %v284_v37 }
 0x106   :  { %458 = vmatprep.subr.mxu1 %v510_v3 }
 0x107   :  { %459 = vmatpush3.msra.mxu1 %v283_v38 }
 0x1b8   :  { %v274_v40 = vpop.f32.mrf.mxu1 }
 0x1b9   :  { %v275_v41 = vadd.f32 %v401_v39, %v274_v40 }
 0x1ba   :  { %v442_v42 = vpop.f32.mrf.mxu1 }
 0x1bb   :  { %vm280_vm5 = vcmp.gt.f32.partialorder %v275_v41, 0.0 }
 0x1bc   :  { %v409_v43 = vsel %vm280_vm5, 1.0, %v510_v3  ;;  %v277_v44 = vpop.f32.mrf.mxu1 }
 0x1bd   :  { %461 = vmatmul.mubr.msk.f32.vlgmr.msra.gmra.mxu1 %vm291_vm4, %v409_v43 }
 0x1be   :  { %v443_v45 = vpop.f32.mrf.mxu1 }
 0x27d   :  { %v365_v46 = vpop.f32.mrf.mxu1 }
 0x27e   :  { %v366_v47 = vadd.f32 -1.0801234, %v365_v46 }
 0x27f   :  { %v462_v48 = vpop.f32.mrf.mxu1 }
 0x280   :  { %370 = vst.msk [vmem:[#allocation2] sm:$0xff] %vm369_vm6, %v366_v47 }
 0x281   :  { %498 = shalt.err (!%p495_p4)
}
 0x282   :  { %380 = dma.vmem_to_hbm [thread:$0]  %s378_s27, 128, %s663_s6, [#allocation3]  }
 0x283   :  { %507 = dma.done.wait [#allocation3], 128  }
 0x284   :  { %508 = vsyncadd [#allocation3], 4294967168 }
 0x285   :  { %384 = vsyncpa [#allocation3], 1 }

</bundles_post_ra>
